<compile_context>
chip_gen: v6e
topology: v6e:2x2x1
jax: 0.10.0
libtpu: 0.0.40
codegen_flags: <defaults>
</compile_context>

<pallas_src>
import jax
import jax.numpy as jnp
from jax.experimental import pallas as pl
from jax.experimental.pallas import tpu as pltpu

INPUT_DIM = 64
HIDDEN_DIM = 128
SEQ_LEN = 8


def rnn_kernel(x_ref, wih_ref, whh_ref, b_ref, o_ref):
    """h_t = tanh(x_t @ Wih + b_ih + h_{t-1} @ Whh + b_hh), h_0 = 0.

    The input projection + both biases are hoisted out of the sequential
    recurrence; only the h @ Whh chain remains on the critical path.
    """
    # Hoisted, time-independent projection: (T, 64) @ (64, 128) + fused bias.
    ih_all = jnp.dot(x_ref[...], wih_ref[...],
                     preferred_element_type=jnp.float32) + b_ref[...]  # (T, 128)

    whh = whh_ref[...]                                                 # (128, 128)
    h = jnp.zeros((1, HIDDEN_DIM), jnp.float32)

    # Static unroll over the (small, fixed) sequence length: static sublane
    # selection of ih_all[t] and one matvec per step.
    for t in range(SEQ_LEN):
        hh = jnp.dot(h, whh, preferred_element_type=jnp.float32)       # (1, 128)
        h = jnp.tanh(ih_all[t:t + 1, :] + hh)

    o_ref[...] = h


@jax.jit
def rnn_forward(x, w_ih, b_ih, w_hh, b_hh):
    """x: (T, 64). w_ih: (128, 64) torch layout, w_hh: (128, 128) torch layout."""
    # Fold transposes / bias fusion once under jit (constant-folded per compile).
    w_ih_t = w_ih.T                                     # (64, 128)
    w_hh_t = w_hh.T                                     # (128, 128)
    b_fused = (b_ih + b_hh).reshape(1, HIDDEN_DIM)      # (1, 128)

    vmem_spec = pl.BlockSpec(memory_space=pltpu.MemorySpace.VMEM)
    out = pl.pallas_call(
        rnn_kernel,
        out_shape=jax.ShapeDtypeStruct((1, HIDDEN_DIM), jnp.float32),
        in_specs=[vmem_spec] * 4,
        out_specs=vmem_spec,
    )(x, w_ih_t, w_hh_t, b_fused)
    return out.reshape(HIDDEN_DIM)


def reference_forward(x, w_ih, b_ih, w_hh, b_hh):
    h = jnp.zeros((HIDDEN_DIM,), jnp.float32)
    for t in range(x.shape[0]):
        h = jnp.tanh(x[t] @ w_ih.T + b_ih + h @ w_hh.T + b_hh)
    return h


if __name__ == "__main__":
    key = jax.random.PRNGKey(0)
    kx, k1, k2, k3, k4 = jax.random.split(key, 5)

    # Deterministic inputs (shapes match torch.nn.Linear(64,128) / (128,128)).
    x = jax.random.normal(kx, (SEQ_LEN, INPUT_DIM), dtype=jnp.float32)
    w_ih = jax.random.normal(k1, (HIDDEN_DIM, INPUT_DIM), dtype=jnp.float32) * 0.1
    b_ih = jax.random.normal(k2, (HIDDEN_DIM,), dtype=jnp.float32) * 0.1
    w_hh = jax.random.normal(k3, (HIDDEN_DIM, HIDDEN_DIM), dtype=jnp.float32) * 0.1
    b_hh = jax.random.normal(k4, (HIDDEN_DIM,), dtype=jnp.float32) * 0.1

    out = rnn_forward(x, w_ih, b_ih, w_hh, b_hh)
    jax.block_until_ready(out)

    ref = reference_forward(x, w_ih, b_ih, w_hh, b_hh)
    assert out.shape == (HIDDEN_DIM,)
    assert jnp.allclose(out, ref, atol=1e-5, rtol=1e-5), "mismatch vs reference"

    print("KERNEL_OK")
</pallas_src>

<mosaic_0001>
module attributes {stable_mosaic.version = 11 : i64} {
  func.func @rnn_kernel(%arg0: memref<8x64xf32, #tpu.memory_space<vmem>>, %arg1: memref<64x128xf32, #tpu.memory_space<vmem>>, %arg2: memref<128x128xf32, #tpu.memory_space<vmem>>, %arg3: memref<1x128xf32, #tpu.memory_space<vmem>>, %arg4: memref<1x128xf32, #tpu.memory_space<vmem>>) attributes {dimension_semantics = [], scalar_prefetch = 0 : i64, scratch_operands = 0 : i64, tpu.core_type = #tpu.core_type<tc>} {
    %c0 = arith.constant 0 : index
    %c0_0 = arith.constant 0 : index
    %0 = vector.load %arg0[%c0, %c0_0] : memref<8x64xf32, #tpu.memory_space<vmem>>, vector<8x64xf32>
    %c0_1 = arith.constant 0 : index
    %c0_2 = arith.constant 0 : index
    %1 = vector.load %arg1[%c0_1, %c0_2] : memref<64x128xf32, #tpu.memory_space<vmem>>, vector<64x128xf32>
    %cst = arith.constant dense<0.000000e+00> : vector<8x128xf32>
    %2 = tpu.matmul %0, %1, %cst {dimension_numbers = #tpu.dot_dimension_numbers<[1], [0], [0], [1], [0, 0, 1, 1], [], []>} : vector<8x64xf32>, vector<64x128xf32>, vector<8x128xf32> -> vector<8x128xf32>
    %c0_3 = arith.constant 0 : index
    %c0_4 = arith.constant 0 : index
    %3 = vector.load %arg3[%c0_3, %c0_4] : memref<1x128xf32, #tpu.memory_space<vmem>>, vector<1x128xf32>
    %4 = vector.broadcast %3 : vector<1x128xf32> to vector<8x128xf32>
    %5 = arith.addf %2, %4 : vector<8x128xf32>
    %c0_5 = arith.constant 0 : index
    %c0_6 = arith.constant 0 : index
    %6 = vector.load %arg2[%c0_5, %c0_6] : memref<128x128xf32, #tpu.memory_space<vmem>>, vector<128x128xf32>
    %cst_7 = arith.constant 0.000000e+00 : f32
    %7 = vector.broadcast %cst_7 : f32 to vector<1x128xf32>
    %cst_8 = arith.constant dense<0.000000e+00> : vector<1x128xf32>
    %8 = tpu.matmul %7, %6, %cst_8 {dimension_numbers = #tpu.dot_dimension_numbers<[1], [0], [0], [1], [0, 0, 1, 1], [], []>} : vector<1x128xf32>, vector<128x128xf32>, vector<1x128xf32> -> vector<1x128xf32>
    %9 = vector.extract_strided_slice %5 {offsets = [0, 0], sizes = [1, 128], strides = [1, 1]} : vector<8x128xf32> to vector<1x128xf32>
    %10 = arith.addf %9, %8 : vector<1x128xf32>
    %11 = math.tanh %10 : vector<1x128xf32>
    %cst_9 = arith.constant dense<0.000000e+00> : vector<1x128xf32>
    %12 = tpu.matmul %11, %6, %cst_9 {dimension_numbers = #tpu.dot_dimension_numbers<[1], [0], [0], [1], [0, 0, 1, 1], [], []>} : vector<1x128xf32>, vector<128x128xf32>, vector<1x128xf32> -> vector<1x128xf32>
    %13 = vector.extract_strided_slice %5 {offsets = [1, 0], sizes = [1, 128], strides = [1, 1]} : vector<8x128xf32> to vector<1x128xf32>
    %14 = arith.addf %13, %12 : vector<1x128xf32>
    %15 = math.tanh %14 : vector<1x128xf32>
    %cst_10 = arith.constant dense<0.000000e+00> : vector<1x128xf32>
    %16 = tpu.matmul %15, %6, %cst_10 {dimension_numbers = #tpu.dot_dimension_numbers<[1], [0], [0], [1], [0, 0, 1, 1], [], []>} : vector<1x128xf32>, vector<128x128xf32>, vector<1x128xf32> -> vector<1x128xf32>
    %17 = vector.extract_strided_slice %5 {offsets = [2, 0], sizes = [1, 128], strides = [1, 1]} : vector<8x128xf32> to vector<1x128xf32>
    %18 = arith.addf %17, %16 : vector<1x128xf32>
    %19 = math.tanh %18 : vector<1x128xf32>
    %cst_11 = arith.constant dense<0.000000e+00> : vector<1x128xf32>
    %20 = tpu.matmul %19, %6, %cst_11 {dimension_numbers = #tpu.dot_dimension_numbers<[1], [0], [0], [1], [0, 0, 1, 1], [], []>} : vector<1x128xf32>, vector<128x128xf32>, vector<1x128xf32> -> vector<1x128xf32>
    %21 = vector.extract_strided_slice %5 {offsets = [3, 0], sizes = [1, 128], strides = [1, 1]} : vector<8x128xf32> to vector<1x128xf32>
    %22 = arith.addf %21, %20 : vector<1x128xf32>
    %23 = math.tanh %22 : vector<1x128xf32>
    %cst_12 = arith.constant dense<0.000000e+00> : vector<1x128xf32>
    %24 = tpu.matmul %23, %6, %cst_12 {dimension_numbers = #tpu.dot_dimension_numbers<[1], [0], [0], [1], [0, 0, 1, 1], [], []>} : vector<1x128xf32>, vector<128x128xf32>, vector<1x128xf32> -> vector<1x128xf32>
    %25 = vector.extract_strided_slice %5 {offsets = [4, 0], sizes = [1, 128], strides = [1, 1]} : vector<8x128xf32> to vector<1x128xf32>
    %26 = arith.addf %25, %24 : vector<1x128xf32>
    %27 = math.tanh %26 : vector<1x128xf32>
    %cst_13 = arith.constant dense<0.000000e+00> : vector<1x128xf32>
    %28 = tpu.matmul %27, %6, %cst_13 {dimension_numbers = #tpu.dot_dimension_numbers<[1], [0], [0], [1], [0, 0, 1, 1], [], []>} : vector<1x128xf32>, vector<128x128xf32>, vector<1x128xf32> -> vector<1x128xf32>
    %29 = vector.extract_strided_slice %5 {offsets = [5, 0], sizes = [1, 128], strides = [1, 1]} : vector<8x128xf32> to vector<1x128xf32>
    %30 = arith.addf %29, %28 : vector<1x128xf32>
    %31 = math.tanh %30 : vector<1x128xf32>
    %cst_14 = arith.constant dense<0.000000e+00> : vector<1x128xf32>
    %32 = tpu.matmul %31, %6, %cst_14 {dimension_numbers = #tpu.dot_dimension_numbers<[1], [0], [0], [1], [0, 0, 1, 1], [], []>} : vector<1x128xf32>, vector<128x128xf32>, vector<1x128xf32> -> vector<1x128xf32>
    %33 = vector.extract_strided_slice %5 {offsets = [6, 0], sizes = [1, 128], strides = [1, 1]} : vector<8x128xf32> to vector<1x128xf32>
    %34 = arith.addf %33, %32 : vector<1x128xf32>
    %35 = math.tanh %34 : vector<1x128xf32>
    %cst_15 = arith.constant dense<0.000000e+00> : vector<1x128xf32>
    %36 = tpu.matmul %35, %6, %cst_15 {dimension_numbers = #tpu.dot_dimension_numbers<[1], [0], [0], [1], [0, 0, 1, 1], [], []>} : vector<1x128xf32>, vector<128x128xf32>, vector<1x128xf32> -> vector<1x128xf32>
    %37 = vector.extract_strided_slice %5 {offsets = [7, 0], sizes = [1, 128], strides = [1, 1]} : vector<8x128xf32> to vector<1x128xf32>
    %38 = arith.addf %37, %36 : vector<1x128xf32>
    %39 = math.tanh %38 : vector<1x128xf32>
    %c0_16 = arith.constant 0 : index
    %c0_17 = arith.constant 0 : index
    %40 = vector.load %arg4[%c0_16, %c0_17] : memref<1x128xf32, #tpu.memory_space<vmem>>, vector<1x128xf32>
    tpu.vector_store %arg4[%c0_16, %c0_17], %39 {strides = array<i32>} : memref<1x128xf32, #tpu.memory_space<vmem>>, vector<1x128xf32>,
    return
  }
}

</mosaic_0001>

<bundles_post_ra>
// kernel: rnn_forward.1
= control target key start
LH: loop header
LB: loop body
LE: loop exit
PB: predicated region body
PF: predicated region fallthrough
CT: control target
= control target key end

     0   :  { %v1241_v1 = vmov 0.0   ;;  %vm1242_vm0 = vmmov 0   ;;  %s1675_s0 = inlined_call_operand.vmem [shape: f32[8,64], index: 0, kind: input, shape index: {}]   ;;  %s1676_s1 = inlined_call_operand.vmem [shape: f32[64,128], index: 1, kind: input, shape index: {}]   ;;  %s1677_s2 = inlined_call_operand.vmem [shape: f32[128,128], index: 2, kind: input, shape index: {}]   ;;  %s1678_s3 = inlined_call_operand.vmem [shape: f32[1,128], index: 3, kind: input, shape index: {}]   ;;  %s1679_s4 = inlined_call_operand.hbm [shape: f32[1,128], index: 4, kind: output, shape index: {}]  }
   0x1   :  { %v1272_v0 = vld [vmem:[%s1677_s2 + $0x78] sm:$0xff]  ;;  %920 = vmatprep.subr.mxu1 %v1241_v1  ;;  %v1278_v2 = vld [vmem:[%s1677_s2 + $0x70] sm:$0xff]  ;;  %901 = vmatprep.subr.mxu0 %v1241_v1  ;;  %v1294_v5 = vld [vmem:[%s1677_s2 + $0x68] sm:$0xff] }
   0x2   :  { %921 = vmatpush3.msra.mxu1 %v1272_v0  ;;  %v26_v3 = vld [vmem:[%s1676_s1 + $0x38] sm:$0xff]  ;;  %v25_v4 = vld [vmem:[%s1676_s1 + $0x30] sm:$0xff]  ;;  %917 = vmatprep.mubr.msk.f32.mxu0 %vm1242_vm0, %v1241_v1  ;;  %v24_v6 = vld [vmem:[%s1676_s1 + $0x28] sm:$0xff] }
   0x3   :  { %922 = vmatprep.subr.mxu1 %v1241_v1  ;;  %902 = vmatpush3.msra.mxu0 %v26_v3  ;;  %v1305_v7 = vld [vmem:[%s1677_s2 + $0x60] sm:$0xff]  ;;  %v1316_v9 = vld [vmem:[%s1677_s2 + $0x58] sm:$0xff] }
   0x4   :  { %923 = vmatpush3.msra.mxu1 %v1278_v2  ;;  %903 = vmatprep.subr.mxu0 %v1241_v1  ;;  %v23_v8 = vld [vmem:[%s1676_s1 + $0x20] sm:$0xff]  ;;  %v22_v10 = vld [vmem:[%s1676_s1 + $0x18] sm:$0xff] }
   0x5   :  { %924 = vmatprep.subr.mxu1 %v1241_v1  ;;  %904 = vmatpush3.msra.mxu0 %v25_v4 }
   0x6   :  { %925 = vmatpush3.msra.mxu1 %v1294_v5  ;;  %905 = vmatprep.subr.mxu0 %v1241_v1 }
   0x7   :  { %926 = vmatprep.subr.mxu1 %v1241_v1  ;;  %906 = vmatpush3.msra.mxu0 %v24_v6 }
   0x8   :  { %927 = vmatpush3.msra.mxu1 %v1305_v7  ;;  %907 = vmatprep.subr.mxu0 %v1241_v1 }
   0x9   :  { %9 = vsyncpa [#allocation3], 0  ;;  %928 = vmatprep.subr.mxu1 %v1241_v1  ;;  %v1327_v11 = vld [vmem:[%s1677_s2 + $0x50] sm:$0xff]  ;;  %908 = vmatpush3.msra.mxu0 %v23_v8  ;;  %v1338_v13 = vld [vmem:[%s1677_s2 + $0x48] sm:$0xff]  ;;  %vm34_vm1 = vcmask 523264  }
   0xa   :  { %929 = vmatpush3.msra.mxu1 %v1316_v9  ;;  %909 = vmatprep.subr.mxu0 %v1241_v1  ;;  %v21_v12 = vld [vmem:[%s1676_s1 + $0x10] sm:$0xff]  ;;  %v20_v14 = vld [vmem:[%s1676_s1 + $0x8] sm:$0xff]  ;;  %v1349_v15 = vld [vmem:[%s1677_s2 + $0x40] sm:$0xff] }
   0xb   :  { %930 = vmatprep.subr.mxu1 %v1241_v1  ;;  %910 = vmatpush3.msra.mxu0 %v22_v10  ;;  %v19_v16 = vld [vmem:[%s1676_s1] sm:$0xff]  ;;  %v1360_v17 = vld [vmem:[%s1677_s2 + $0x38] sm:$0xff]  ;;  %v1371_v19 = vld [vmem:[%s1677_s2 + $0x30] sm:$0xff] }
   0xc   :  { %931 = vmatpush3.msra.mxu1 %v1327_v11  ;;  %911 = vmatprep.subr.mxu0 %v1241_v1  ;;  %v18_v18 = vld [vmem:[%s1675_s0] sm:$0xff]  ;;  %v1378_v20 = vld [vmem:[%s1677_s2 + $0x28] sm:$0xff]  ;;  %v1397_v22 = vld [vmem:[%s1677_s2 + $0x18] sm:$0xff] }
   0xd   :  { %932 = vmatprep.subr.mxu1 %v1241_v1  ;;  %912 = vmatpush3.msra.mxu0 %v21_v12  ;;  %v1388_v21 = vld [vmem:[%s1677_s2 + $0x20] sm:$0xff]  ;;  %v1406_v23 = vld [vmem:[%s1677_s2 + $0x10] sm:$0xff]  ;;  %v1415_v24 = vld [vmem:[%s1677_s2 + $0x8] sm:$0xff] }
   0xe   :  { %933 = vmatpush3.msra.mxu1 %v1338_v13  ;;  %913 = vmatprep.subr.mxu0 %v1241_v1  ;;  %v1424_v25 = vld [vmem:[%s1677_s2] sm:$0xff] }
   0xf   :  { %934 = vmatprep.subr.mxu1 %v1241_v1  ;;  %914 = vmatpush3.msra.mxu0 %v20_v14  ;;  %v754_v28 = vld [vmem:[%s1678_s3] ss:$0 sm:$0xff]  ;;  %s1243_s3 = smov [#allocation2]  }
  0x10   :  { %935 = vmatpush3.msra.mxu1 %v1349_v15  ;;  %915 = vmatprep.subr.mxu0 %v1241_v1  ;;  %s746_s12 = sshll.u32 %s1243_s3, 4  ;;  %s747_s12 = int_to_ptr.vmem [resolvable:$true] %s746_s12 }
  0x11   :  { %936 = vmatprep.subr.mxu1 %v1241_v1  ;;  %916 = vmatpush3.msra.mxu0 %v19_v16  ;;  %s1219_s13 = scalar_lea.vmem %s747_s12, 16  ;;  %s1223_s14 = scalar_lea.vmem %s747_s12, 32 }
  0x12   :  { %937 = vmatpush3.msra.mxu1 %v1360_v17  ;;  %918 = vmatmul.mubr.msk.f32.vlgmr.msra.gmra.mxu0 %vm34_vm1, %v18_v18  ;;  %p1220_p0 = scmp.ne.s32.totalorder %s747_s12, %s1219_s13  ;;  %p1224_p1 = scmp.lt.s32.totalorder %s747_s12, %s747_s12 }
  0x13   :  { %938 = vmatprep.subr.mxu1 %v1241_v1  ;;  %952 = vmatprep.mubr.msk.f32.mxu1 %vm1242_vm0, %v1241_v1  ;;  %p1225_p2 = scmp.lt.s32.totalorder %s1223_s14, %s1219_s13 }
  0x14   :  { %939 = vmatpush3.msra.mxu1 %v1371_v19  ;;  %955 = vmatprep.subr.mxu0 %v1241_v1 }
  0x15   :  { %940 = vmatprep.subr.mxu1 %v1241_v1  ;;  %956 = vmatpush3.msra.mxu0 %v1272_v0  ;;  %p1226_p3 = por %p1225_p2, %p1224_p1 }
  0x16   :  { %941 = vmatpush3.msra.mxu1 %v1378_v20  ;;  %957 = vmatprep.subr.mxu0 %v1241_v1 }
  0x17   :  { %942 = vmatprep.subr.mxu1 %v1241_v1  ;;  %958 = vmatpush3.msra.mxu0 %v1278_v2  ;;  %p1227_p4 = pnand %p1226_p3, %p1220_p0 }
  0x18   :  { %943 = vmatpush3.msra.mxu1 %v1388_v21  ;;  %959 = vmatprep.subr.mxu0 %v1241_v1 }
  0x19   :  { %944 = vmatprep.subr.mxu1 %v1241_v1  ;;  %960 = vmatpush3.msra.mxu0 %v1294_v5 }
  0x1a   :  { %945 = vmatpush3.msra.mxu1 %v1397_v22  ;;  %961 = vmatprep.subr.mxu0 %v1241_v1 }
  0x1b   :  { %946 = vmatprep.subr.mxu1 %v1241_v1  ;;  %962 = vmatpush3.msra.mxu0 %v1305_v7 }
  0x1c   :  { %947 = vmatpush3.msra.mxu1 %v1406_v23  ;;  %963 = vmatprep.subr.mxu0 %v1241_v1 }
  0x1d   :  { %948 = vmatprep.subr.mxu1 %v1241_v1  ;;  %964 = vmatpush3.msra.mxu0 %v1316_v9 }
  0x1e   :  { %949 = vmatpush3.msra.mxu1 %v1415_v24  ;;  %965 = vmatprep.subr.mxu0 %v1241_v1 }
  0x1f   :  { %950 = vmatprep.subr.mxu1 %v1241_v1  ;;  %966 = vmatpush3.msra.mxu0 %v1327_v11 }
  0x20   :  { %951 = vmatpush3.msra.mxu1 %v1424_v25  ;;  %967 = vmatprep.subr.mxu0 %v1241_v1 }
  0x21   :  { %953 = vmatmul.mubr.f32.vlgmr.msra.gmra.mxu1 %v1241_v1  ;;  %968 = vmatpush3.msra.mxu0 %v1338_v13 }
  0x22   :  { %969 = vmatprep.subr.mxu0 %v1241_v1  ;;  %987 = vmatprep.mubr.msk.f32.mxu0 %vm1242_vm0, %v1241_v1 }
  0x23   :  { %970 = vmatpush3.msra.mxu0 %v1349_v15  ;;  %990 = vmatprep.subr.mxu1 %v1241_v1 }
  0x24   :  { %971 = vmatprep.subr.mxu0 %v1241_v1  ;;  %991 = vmatpush3.msra.mxu1 %v1272_v0 }
  0x25   :  { %972 = vmatpush3.msra.mxu0 %v1360_v17  ;;  %992 = vmatprep.subr.mxu1 %v1241_v1 }
  0x26   :  { %973 = vmatprep.subr.mxu0 %v1241_v1  ;;  %993 = vmatpush3.msra.mxu1 %v1278_v2 }
  0x27   :  { %974 = vmatpush3.msra.mxu0 %v1371_v19  ;;  %994 = vmatprep.subr.mxu1 %v1241_v1 }
  0x28   :  { %975 = vmatprep.subr.mxu0 %v1241_v1  ;;  %995 = vmatpush3.msra.mxu1 %v1294_v5 }
  0x29   :  { %976 = vmatpush3.msra.mxu0 %v1378_v20  ;;  %996 = vmatprep.subr.mxu1 %v1241_v1 }
  0x2a   :  { %977 = vmatprep.subr.mxu0 %v1241_v1  ;;  %997 = vmatpush3.msra.mxu1 %v1305_v7 }
  0x2b   :  { %978 = vmatpush3.msra.mxu0 %v1388_v21  ;;  %998 = vmatprep.subr.mxu1 %v1241_v1 }
  0x2c   :  { %979 = vmatprep.subr.mxu0 %v1241_v1  ;;  %999 = vmatpush3.msra.mxu1 %v1316_v9 }
  0x2d   :  { %980 = vmatpush3.msra.mxu0 %v1397_v22  ;;  %1000 = vmatprep.subr.mxu1 %v1241_v1 }
  0x2e   :  { %981 = vmatprep.subr.mxu0 %v1241_v1  ;;  %1001 = vmatpush3.msra.mxu1 %v1327_v11 }
  0x2f   :  { %982 = vmatpush3.msra.mxu0 %v1406_v23  ;;  %1002 = vmatprep.subr.mxu1 %v1241_v1 }
  0x30   :  { %983 = vmatprep.subr.mxu0 %v1241_v1  ;;  %1003 = vmatpush3.msra.mxu1 %v1338_v13 }
  0x31   :  { %984 = vmatpush3.msra.mxu0 %v1415_v24  ;;  %1004 = vmatprep.subr.mxu1 %v1241_v1 }
  0x32   :  { %985 = vmatprep.subr.mxu0 %v1241_v1  ;;  %1005 = vmatpush3.msra.mxu1 %v1349_v15 }
  0x33   :  { %986 = vmatpush3.msra.mxu0 %v1424_v25  ;;  %1006 = vmatprep.subr.mxu1 %v1241_v1 }
  0x34   :  { %1007 = vmatpush3.msra.mxu1 %v1360_v17  ;;  %1022 = vmatprep.mubr.msk.f32.mxu1 %vm1242_vm0, %v1241_v1 }
  0x35   :  { %1008 = vmatprep.subr.mxu1 %v1241_v1  ;;  %1025 = vmatprep.subr.mxu0 %v1241_v1 }
  0x36   :  { %1009 = vmatpush3.msra.mxu1 %v1371_v19 }
  0x37   :  { %1010 = vmatprep.subr.mxu1 %v1241_v1 }
  0x38   :  { %1011 = vmatpush3.msra.mxu1 %v1378_v20 }
  0x39   :  { %1012 = vmatprep.subr.mxu1 %v1241_v1 }
  0x3a   :  { %1013 = vmatpush3.msra.mxu1 %v1388_v21 }
  0x3b   :  { %1014 = vmatprep.subr.mxu1 %v1241_v1 }
  0x3c   :  { %1015 = vmatpush3.msra.mxu1 %v1397_v22 }
  0x3d   :  { %1016 = vmatprep.subr.mxu1 %v1241_v1 }
  0x3e   :  { %1017 = vmatpush3.msra.mxu1 %v1406_v23 }
  0x3f   :  { %1018 = vmatprep.subr.mxu1 %v1241_v1 }
  0x40   :  { %1019 = vmatpush3.msra.mxu1 %v1415_v24 }
  0x41   :  { %1020 = vmatprep.subr.mxu1 %v1241_v1 }
  0x42   :  { %1021 = vmatpush3.msra.mxu1 %v1424_v25 }
  0x43   :  { %1060 = vmatprep.subr.mxu1 %v1241_v1 }
  0xd2   :  { %v104_v26 = vpop.f32.mrf.mxu0 }
  0xd3   :  { %v1494_v29 = vadd.f32 %v754_v28, %v104_v26 }
  0xd4   :  { %v919_v27 = vpop.f32.mrf.mxu0 }
  0xe1   :  { %v190_v30 = vpop.f32.mrf.mxu1 }
  0xe2   :  { %v194_v31 = vadd.f32 %v190_v30, %v1494_v29 }
  0xe3   :  { %v954_v32 = vpop.f32.mrf.mxu1 }
  0xe4   :  { %1203 = vtanh.f32 %v194_v31 }
  0xf1   :  { %v1204_v33 = vpop.eup %1203 }
  0xf2   :  { %988 = vmatmul.mubr.f32.vlgmr.msra.gmra.mxu0 %v1204_v33 }
  0xf3   :  { %1026 = vmatpush3.msra.mxu0 %v1272_v0  ;;  %1057 = vmatprep.mubr.msk.f32.mxu0 %vm1242_vm0, %v1241_v1 }
  0xf4   :  { %1027 = vmatprep.subr.mxu0 %v1241_v1 }
  0xf5   :  { %1028 = vmatpush3.msra.mxu0 %v1278_v2 }
  0xf6   :  { %1029 = vmatprep.subr.mxu0 %v1241_v1 }
  0xf7   :  { %1030 = vmatpush3.msra.mxu0 %v1294_v5 }
  0xf8   :  { %1031 = vmatprep.subr.mxu0 %v1241_v1 }
  0xf9   :  { %1032 = vmatpush3.msra.mxu0 %v1305_v7 }
  0xfa   :  { %1033 = vmatprep.subr.mxu0 %v1241_v1 }
  0xfb   :  { %1034 = vmatpush3.msra.mxu0 %v1316_v9 }
  0xfc   :  { %1035 = vmatprep.subr.mxu0 %v1241_v1 }
  0xfd   :  { %1036 = vmatpush3.msra.mxu0 %v1327_v11 }
  0xfe   :  { %1037 = vmatprep.subr.mxu0 %v1241_v1 }
  0xff   :  { %1038 = vmatpush3.msra.mxu0 %v1338_v13 }
 0x100   :  { %1039 = vmatprep.subr.mxu0 %v1241_v1 }
 0x101   :  { %1040 = vmatpush3.msra.mxu0 %v1349_v15 }
 0x102   :  { %1041 = vmatprep.subr.mxu0 %v1241_v1 }
 0x103   :  { %1042 = vmatpush3.msra.mxu0 %v1360_v17 }
 0x104   :  { %1043 = vmatprep.subr.mxu0 %v1241_v1 }
 0x105   :  { %1044 = vmatpush3.msra.mxu0 %v1371_v19 }
 0x106   :  { %1045 = vmatprep.subr.mxu0 %v1241_v1 }
 0x107   :  { %1046 = vmatpush3.msra.mxu0 %v1378_v20 }
 0x108   :  { %1047 = vmatprep.subr.mxu0 %v1241_v1 }
 0x109   :  { %1048 = vmatpush3.msra.mxu0 %v1388_v21 }
 0x10a   :  { %1049 = vmatprep.subr.mxu0 %v1241_v1 }
 0x10b   :  { %1050 = vmatpush3.msra.mxu0 %v1397_v22 }
 0x10c   :  { %1051 = vmatprep.subr.mxu0 %v1241_v1 }
 0x10d   :  { %1052 = vmatpush3.msra.mxu0 %v1406_v23 }
 0x10e   :  { %1053 = vmatprep.subr.mxu0 %v1241_v1 }
 0x10f   :  { %1054 = vmatpush3.msra.mxu0 %v1415_v24 }
 0x110   :  { %1055 = vmatprep.subr.mxu0 %v1241_v1 }
 0x111   :  { %1056 = vmatpush3.msra.mxu0 %v1424_v25 }
 0x112   :  { %1095 = vmatprep.subr.mxu0 %v1241_v1 }
 0x1b2   :  { %v262_v34 = vpop.f32.mrf.mxu0 }
 0x1b3   :  { %v267_v35 = vrot.slane %v262_v34, 7 }
 0x1b4   :  { %v989_v36 = vpop.f32.mrf.mxu0 }
 0x1b5   :  { %v269_v37 = vadd.f32 %v267_v35, %v1494_v29 }
 0x1b7   :  { %1205 = vtanh.f32 %v269_v37 }
 0x1c4   :  { %v1206_v38 = vpop.eup %1205 }
 0x1c5   :  { %v272_v39 = vrot.slane %v1206_v38, 1 }
 0x1c7   :  { %1023 = vmatmul.mubr.f32.vlgmr.msra.gmra.mxu1 %v272_v39 }
 0x1c8   :  { %1061 = vmatpush3.msra.mxu1 %v1272_v0  ;;  %1092 = vmatprep.mubr.msk.f32.mxu1 %vm1242_vm0, %v1241_v1 }
 0x1c9   :  { %1062 = vmatprep.subr.mxu1 %v1241_v1 }
 0x1ca   :  { %1063 = vmatpush3.msra.mxu1 %v1278_v2 }
 0x1cb   :  { %1064 = vmatprep.subr.mxu1 %v1241_v1 }
 0x1cc   :  { %1065 = vmatpush3.msra.mxu1 %v1294_v5 }
 0x1cd   :  { %1066 = vmatprep.subr.mxu1 %v1241_v1 }
 0x1ce   :  { %1067 = vmatpush3.msra.mxu1 %v1305_v7 }
 0x1cf   :  { %1068 = vmatprep.subr.mxu1 %v1241_v1 }
 0x1d0   :  { %1069 = vmatpush3.msra.mxu1 %v1316_v9 }
 0x1d1   :  { %1070 = vmatprep.subr.mxu1 %v1241_v1 }
 0x1d2   :  { %1071 = vmatpush3.msra.mxu1 %v1327_v11 }
 0x1d3   :  { %1072 = vmatprep.subr.mxu1 %v1241_v1 }
 0x1d4   :  { %1073 = vmatpush3.msra.mxu1 %v1338_v13 }
 0x1d5   :  { %1074 = vmatprep.subr.mxu1 %v1241_v1 }
 0x1d6   :  { %1075 = vmatpush3.msra.mxu1 %v1349_v15 }
 0x1d7   :  { %1076 = vmatprep.subr.mxu1 %v1241_v1 }
 0x1d8   :  { %1077 = vmatpush3.msra.mxu1 %v1360_v17 }
 0x1d9   :  { %1078 = vmatprep.subr.mxu1 %v1241_v1 }
 0x1da   :  { %1079 = vmatpush3.msra.mxu1 %v1371_v19 }
 0x1db   :  { %1080 = vmatprep.subr.mxu1 %v1241_v1 }
 0x1dc   :  { %1081 = vmatpush3.msra.mxu1 %v1378_v20 }
 0x1dd   :  { %1082 = vmatprep.subr.mxu1 %v1241_v1 }
 0x1de   :  { %1083 = vmatpush3.msra.mxu1 %v1388_v21 }
 0x1df   :  { %1084 = vmatprep.subr.mxu1 %v1241_v1 }
 0x1e0   :  { %1085 = vmatpush3.msra.mxu1 %v1397_v22 }
 0x1e1   :  { %1086 = vmatprep.subr.mxu1 %v1241_v1 }
 0x1e2   :  { %1087 = vmatpush3.msra.mxu1 %v1406_v23 }
 0x1e3   :  { %1088 = vmatprep.subr.mxu1 %v1241_v1 }
 0x1e4   :  { %1089 = vmatpush3.msra.mxu1 %v1415_v24 }
 0x1e5   :  { %1090 = vmatprep.subr.mxu1 %v1241_v1 }
 0x1e6   :  { %1091 = vmatpush3.msra.mxu1 %v1424_v25 }
 0x1e7   :  { %1130 = vmatprep.subr.mxu1 %v1241_v1 }
 0x287   :  { %v340_v40 = vpop.f32.mrf.mxu1 }
 0x288   :  { %v345_v41 = vrot.slane %v340_v40, 6 }
 0x289   :  { %v1024_v42 = vpop.f32.mrf.mxu1 }
 0x28a   :  { %v347_v43 = vadd.f32 %v345_v41, %v1494_v29 }
 0x28c   :  { %1207 = vtanh.f32 %v347_v43 }
 0x299   :  { %v1208_v44 = vpop.eup %1207 }
 0x29a   :  { %v350_v45 = vrot.slane %v1208_v44, 2 }
 0x29c   :  { %1058 = vmatmul.mubr.f32.vlgmr.msra.gmra.mxu0 %v350_v45 }
 0x29d   :  { %1096 = vmatpush3.msra.mxu0 %v1272_v0  ;;  %1127 = vmatprep.mubr.msk.f32.mxu0 %vm1242_vm0, %v1241_v1 }
 0x29e   :  { %1097 = vmatprep.subr.mxu0 %v1241_v1 }
 0x29f   :  { %1098 = vmatpush3.msra.mxu0 %v1278_v2 }
 0x2a0   :  { %1099 = vmatprep.subr.mxu0 %v1241_v1 }
 0x2a1   :  { %1100 = vmatpush3.msra.mxu0 %v1294_v5 }
 0x2a2   :  { %1101 = vmatprep.subr.mxu0 %v1241_v1 }
 0x2a3   :  { %1102 = vmatpush3.msra.mxu0 %v1305_v7 }
 0x2a4   :  { %1103 = vmatprep.subr.mxu0 %v1241_v1 }
 0x2a5   :  { %1104 = vmatpush3.msra.mxu0 %v1316_v9 }
 0x2a6   :  { %1105 = vmatprep.subr.mxu0 %v1241_v1 }
 0x2a7   :  { %1106 = vmatpush3.msra.mxu0 %v1327_v11 }
 0x2a8   :  { %1107 = vmatprep.subr.mxu0 %v1241_v1 }
 0x2a9   :  { %1108 = vmatpush3.msra.mxu0 %v1338_v13 }
 0x2aa   :  { %1109 = vmatprep.subr.mxu0 %v1241_v1 }
 0x2ab   :  { %1110 = vmatpush3.msra.mxu0 %v1349_v15 }
 0x2ac   :  { %1111 = vmatprep.subr.mxu0 %v1241_v1 }
 0x2ad   :  { %1112 = vmatpush3.msra.mxu0 %v1360_v17 }
 0x2ae   :  { %1113 = vmatprep.subr.mxu0 %v1241_v1 }
 0x2af   :  { %1114 = vmatpush3.msra.mxu0 %v1371_v19 }
 0x2b0   :  { %1115 = vmatprep.subr.mxu0 %v1241_v1 }
 0x2b1   :  { %1116 = vmatpush3.msra.mxu0 %v1378_v20 }
 0x2b2   :  { %1117 = vmatprep.subr.mxu0 %v1241_v1 }
 0x2b3   :  { %1118 = vmatpush3.msra.mxu0 %v1388_v21 }
 0x2b4   :  { %1119 = vmatprep.subr.mxu0 %v1241_v1 }
 0x2b5   :  { %1120 = vmatpush3.msra.mxu0 %v1397_v22 }
 0x2b6   :  { %1121 = vmatprep.subr.mxu0 %v1241_v1 }
 0x2b7   :  { %1122 = vmatpush3.msra.mxu0 %v1406_v23 }
 0x2b8   :  { %1123 = vmatprep.subr.mxu0 %v1241_v1 }
 0x2b9   :  { %1124 = vmatpush3.msra.mxu0 %v1415_v24 }
 0x2ba   :  { %1125 = vmatprep.subr.mxu0 %v1241_v1 }
 0x2bb   :  { %1126 = vmatpush3.msra.mxu0 %v1424_v25 }
 0x2bc   :  { %1165 = vmatprep.subr.mxu0 %v1241_v1 }
 0x35c   :  { %v418_v46 = vpop.f32.mrf.mxu0 }
 0x35d   :  { %v423_v47 = vrot.slane %v418_v46, 5 }
 0x35e   :  { %v1059_v48 = vpop.f32.mrf.mxu0 }
 0x35f   :  { %v425_v49 = vadd.f32 %v423_v47, %v1494_v29 }
 0x361   :  { %1209 = vtanh.f32 %v425_v49 }
 0x36e   :  { %v1210_v50 = vpop.eup %1209 }
 0x36f   :  { %v428_v51 = vrot.slane %v1210_v50, 3 }
 0x371   :  { %1093 = vmatmul.mubr.f32.vlgmr.msra.gmra.mxu1 %v428_v51 }
 0x372   :  { %1131 = vmatpush3.msra.mxu1 %v1272_v0  ;;  %1162 = vmatprep.mubr.msk.f32.mxu1 %vm1242_vm0, %v1241_v1 }
 0x373   :  { %1132 = vmatprep.subr.mxu1 %v1241_v1 }
 0x374   :  { %1133 = vmatpush3.msra.mxu1 %v1278_v2 }
 0x375   :  { %1134 = vmatprep.subr.mxu1 %v1241_v1 }
 0x376   :  { %1135 = vmatpush3.msra.mxu1 %v1294_v5 }
 0x377   :  { %1136 = vmatprep.subr.mxu1 %v1241_v1 }
 0x378   :  { %1137 = vmatpush3.msra.mxu1 %v1305_v7 }
 0x379   :  { %1138 = vmatprep.subr.mxu1 %v1241_v1 }
 0x37a   :  { %1139 = vmatpush3.msra.mxu1 %v1316_v9 }
 0x37b   :  { %1140 = vmatprep.subr.mxu1 %v1241_v1 }
 0x37c   :  { %1141 = vmatpush3.msra.mxu1 %v1327_v11 }
 0x37d   :  { %1142 = vmatprep.subr.mxu1 %v1241_v1 }
 0x37e   :  { %1143 = vmatpush3.msra.mxu1 %v1338_v13 }
 0x37f   :  { %1144 = vmatprep.subr.mxu1 %v1241_v1 }
 0x380   :  { %1145 = vmatpush3.msra.mxu1 %v1349_v15 }
 0x381   :  { %1146 = vmatprep.subr.mxu1 %v1241_v1 }
 0x382   :  { %1147 = vmatpush3.msra.mxu1 %v1360_v17 }
 0x383   :  { %1148 = vmatprep.subr.mxu1 %v1241_v1 }
 0x384   :  { %1149 = vmatpush3.msra.mxu1 %v1371_v19 }
 0x385   :  { %1150 = vmatprep.subr.mxu1 %v1241_v1 }
 0x386   :  { %1151 = vmatpush3.msra.mxu1 %v1378_v20 }
 0x387   :  { %1152 = vmatprep.subr.mxu1 %v1241_v1 }
 0x388   :  { %1153 = vmatpush3.msra.mxu1 %v1388_v21 }
 0x389   :  { %1154 = vmatprep.subr.mxu1 %v1241_v1 }
 0x38a   :  { %1155 = vmatpush3.msra.mxu1 %v1397_v22 }
 0x38b   :  { %1156 = vmatprep.subr.mxu1 %v1241_v1 }
 0x38c   :  { %1157 = vmatpush3.msra.mxu1 %v1406_v23 }
 0x38d   :  { %1158 = vmatprep.subr.mxu1 %v1241_v1 }
 0x38e   :  { %1159 = vmatpush3.msra.mxu1 %v1415_v24 }
 0x38f   :  { %1160 = vmatprep.subr.mxu1 %v1241_v1 }
 0x390   :  { %1161 = vmatpush3.msra.mxu1 %v1424_v25 }
 0x431   :  { %v496_v52 = vpop.f32.mrf.mxu1 }
 0x432   :  { %v501_v53 = vrot.slane %v496_v52, 4 }
 0x433   :  { %v1094_v54 = vpop.f32.mrf.mxu1 }
 0x434   :  { %v503_v55 = vadd.f32 %v501_v53, %v1494_v29 }
 0x436   :  { %1211 = vtanh.f32 %v503_v55 }
 0x443   :  { %v1212_v56 = vpop.eup %1211 }
 0x444   :  { %v506_v57 = vrot.slane %v1212_v56, 4 }
 0x446   :  { %1128 = vmatmul.mubr.f32.vlgmr.msra.gmra.mxu0 %v506_v57 }
 0x447   :  { %1166 = vmatpush3.msra.mxu0 %v1272_v0  ;;  %1197 = vmatprep.mubr.msk.f32.mxu0 %vm1242_vm0, %v1241_v1 }
 0x448   :  { %1167 = vmatprep.subr.mxu0 %v1241_v1 }
 0x449   :  { %1168 = vmatpush3.msra.mxu0 %v1278_v2 }
 0x44a   :  { %1169 = vmatprep.subr.mxu0 %v1241_v1 }
 0x44b   :  { %1170 = vmatpush3.msra.mxu0 %v1294_v5 }
 0x44c   :  { %1171 = vmatprep.subr.mxu0 %v1241_v1 }
 0x44d   :  { %1172 = vmatpush3.msra.mxu0 %v1305_v7 }
 0x44e   :  { %1173 = vmatprep.subr.mxu0 %v1241_v1 }
 0x44f   :  { %1174 = vmatpush3.msra.mxu0 %v1316_v9 }
 0x450   :  { %1175 = vmatprep.subr.mxu0 %v1241_v1 }
 0x451   :  { %1176 = vmatpush3.msra.mxu0 %v1327_v11 }
 0x452   :  { %1177 = vmatprep.subr.mxu0 %v1241_v1 }
 0x453   :  { %1178 = vmatpush3.msra.mxu0 %v1338_v13 }
 0x454   :  { %1179 = vmatprep.subr.mxu0 %v1241_v1 }
 0x455   :  { %1180 = vmatpush3.msra.mxu0 %v1349_v15 }
 0x456   :  { %1181 = vmatprep.subr.mxu0 %v1241_v1 }
 0x457   :  { %1182 = vmatpush3.msra.mxu0 %v1360_v17 }
 0x458   :  { %1183 = vmatprep.subr.mxu0 %v1241_v1 }
 0x459   :  { %1184 = vmatpush3.msra.mxu0 %v1371_v19 }
 0x45a   :  { %1185 = vmatprep.subr.mxu0 %v1241_v1 }
 0x45b   :  { %1186 = vmatpush3.msra.mxu0 %v1378_v20 }
 0x45c   :  { %1187 = vmatprep.subr.mxu0 %v1241_v1 }
 0x45d   :  { %1188 = vmatpush3.msra.mxu0 %v1388_v21 }
 0x45e   :  { %1189 = vmatprep.subr.mxu0 %v1241_v1 }
 0x45f   :  { %1190 = vmatpush3.msra.mxu0 %v1397_v22 }
 0x460   :  { %1191 = vmatprep.subr.mxu0 %v1241_v1 }
 0x461   :  { %1192 = vmatpush3.msra.mxu0 %v1406_v23 }
 0x462   :  { %1193 = vmatprep.subr.mxu0 %v1241_v1 }
 0x463   :  { %1194 = vmatpush3.msra.mxu0 %v1415_v24 }
 0x464   :  { %1195 = vmatprep.subr.mxu0 %v1241_v1 }
 0x465   :  { %1196 = vmatpush3.msra.mxu0 %v1424_v25 }
 0x506   :  { %v574_v58 = vpop.f32.mrf.mxu0 }
 0x507   :  { %v579_v59 = vrot.slane %v574_v58, 3 }
 0x508   :  { %v1129_v60 = vpop.f32.mrf.mxu0 }
 0x509   :  { %v581_v61 = vadd.f32 %v579_v59, %v1494_v29 }
 0x50b   :  { %1213 = vtanh.f32 %v581_v61 }
 0x518   :  { %v1214_v62 = vpop.eup %1213 }
 0x519   :  { %v584_v63 = vrot.slane %v1214_v62, 5 }
 0x51b   :  { %1163 = vmatmul.mubr.f32.vlgmr.msra.gmra.mxu1 %v584_v63 }
 0x5db   :  { %v652_v0 = vpop.f32.mrf.mxu1 }
 0x5dc   :  { %v657_v2 = vrot.slane %v652_v0, 2 }
 0x5dd   :  { %v1164_v3 = vpop.f32.mrf.mxu1 }
 0x5de   :  { %v659_v4 = vadd.f32 %v657_v2, %v1494_v29 }
 0x5e0   :  { %1215 = vtanh.f32 %v659_v4 }
 0x5ed   :  { %v1216_v5 = vpop.eup %1215 }
 0x5ee   :  { %v662_v6 = vrot.slane %v1216_v5, 6 }
 0x5f0   :  { %1198 = vmatmul.mubr.f32.vlgmr.msra.gmra.mxu0 %v662_v6 }
 0x6b0   :  { %v730_v1 = vpop.f32.mrf.mxu0 }
 0x6b1   :  { %v735_v7 = vrot.slane %v730_v1, 1 }
 0x6b2   :  { %v1199_v8 = vpop.f32.mrf.mxu0 }
 0x6b3   :  { %v737_v9 = vadd.f32 %v735_v7, %v1494_v29 }
 0x6b5   :  { %1217 = vtanh.f32 %v737_v9 }
 0x6c2   :  { %v1218_v10 = vpop.eup %1217 }
 0x6c3   :  { %739 = vst [vmem:[#allocation2 - $0x7] sm:$0x80] %v1218_v10 }
 0x6c4   :  { %1230 = shalt.err (!%p1227_p4)
}
 0x6c5   :  { %749 = dma.vmem_to_hbm [thread:$0]  %s747_s12, 16, %s1679_s4, [#allocation3]  }
 0x6c6   :  { %1239 = dma.done.wait [#allocation3], 16  }
 0x6c7   :  { %1240 = vsyncadd [#allocation3], 4294967280 }
 0x6c8   :  { %753 = vsyncpa [#allocation3], 1 }

</bundles_post_ra>
